<compile_context>
chip_gen: v7x
topology: tpu7x:2x2x1
jax: 0.10.0
libtpu: 0.0.40
codegen_flags: <defaults>
</compile_context>

<pallas_src>
import functools

import jax
import jax.numpy as jnp
from jax.experimental import pallas as pl
from jax.experimental.pallas import tpu as pltpu


def _legendre_kernel(x_ref, o_ref, *, degree: int, chunk: int):
    # x_ref: (bm, 128) float32 inputs (lane-dense).
    # o_ref: (degree+1, bm, 128); o_ref[k] holds P_k.
    bm = x_ref.shape[0]
    n_chunks = bm // chunk
    out_dtype = o_ref.dtype

    # Process the block in small row chunks so x, P_{k-1}, P_k stay in vregs.
    @pl.loop(0, n_chunks)
    def _(c):
        r0 = pl.multiple_of(c * chunk, chunk)
        rows = pl.ds(r0, chunk)
        x = x_ref[rows, :]                       # (chunk, 128)
        ones = jnp.ones_like(x)
        o_ref[0, rows, :] = ones.astype(out_dtype)          # P_0 = 1
        if degree > 0:
            p_km1 = ones
            p_k = x
            o_ref[1, rows, :] = p_k.astype(out_dtype)        # P_1 = x
            # TODO(synk): for very high degree, replace this static unroll with
            # a degree-chunked grid axis to bound compile time / code size.
            for k in range(1, degree):           # static unroll over degree
                a = (2.0 * k + 1.0) / (k + 1.0)
                b = float(k) / (k + 1.0)
                p_kp1 = (a * x) * p_k - b * p_km1
                o_ref[k + 1, rows, :] = p_kp1.astype(out_dtype)
                p_km1, p_k = p_k, p_kp1


def legendre_pallas(x: jax.Array, degree: int, *,
                    out_dtype=jnp.float32,
                    transpose_output: bool = True) -> jax.Array:
    """Evaluate Legendre polynomials 0..degree at every element of x.

    Returns (x.size, degree+1) in `out_dtype` (default float32, matching the
    PyTorch module).  With transpose_output=False, returns the lane-major
    (degree+1, x.size) layout and skips the final XLA transpose.
    """
    n_out = degree + 1
    xf = x.reshape(-1).astype(jnp.float32)
    n = xf.shape[0]

    # Pad N up to a multiple of 128 so elements fill whole lane rows.
    n_rows = -(-n // 128)
    n_pad = n_rows * 128
    if n_pad != n:
        xf = jnp.pad(xf, (0, n_pad - n))
    x2d = xf.reshape(n_rows, 128)

    out_itemsize = jnp.dtype(out_dtype).itemsize

    # ---- Degree-aware tile size --------------------------------------------
    # Target ~12 MiB of double-buffered (input + output) blocks per grid step:
    # big enough to amortize the ~0.35us/step cost, small enough to fit v5e /
    # v6e / v7x once vmem_limit_bytes is raised explicitly.
    target_bytes = 12 << 20
    per_row_bytes = 2 * 128 * (4 + n_out * out_itemsize)     # double-buffered
    bm = max(8, min(target_bytes // per_row_bytes, 2048))
    # Keep >= 2 grid steps so ("parallel",) can shard across v7x's two TCs.
    bm = min(bm, max(8, pl.cdiv(n_rows, 2)))

    gran = 16 if out_itemsize == 2 else 8       # sublane granularity
    if bm >= n_rows:
        bm = n_rows                             # full-dim block is always legal
        chunk = min(bm, 64)
        if bm % chunk != 0:
            chunk = bm
    elif bm >= 64:
        bm = (bm // 64) * 64
        chunk = 64
    else:
        bm = min(n_rows, max(gran, (bm // gran) * gran))
        chunk = bm

    grid = (pl.cdiv(n_rows, bm),)

    # Explicit VMEM budget (double-buffered in/out blocks + headroom).
    in_block_bytes = bm * 128 * 4
    out_block_bytes = n_out * bm * 128 * out_itemsize
    need = 2 * (in_block_bytes + out_block_bytes)
    vmem_limit = int(min(48 << 20, max(32 << 20, 2 * need)))

    kernel = functools.partial(_legendre_kernel, degree=degree, chunk=chunk)

    cost = pl.CostEstimate(
        flops=3 * max(degree, 1) * n_pad,
        transcendentals=0,
        bytes_accessed=n_pad * 4 + n_pad * n_out * out_itemsize,
    )

    out = pl.pallas_call(
        kernel,
        out_shape=jax.ShapeDtypeStruct((n_out, n_rows, 128), out_dtype),
        grid_spec=pltpu.PrefetchScalarGridSpec(
            num_scalar_prefetch=0,
            grid=grid,
            in_specs=[pl.BlockSpec((bm, 128), lambda i: (i, 0))],
            out_specs=pl.BlockSpec((n_out, bm, 128), lambda i: (0, i, 0)),
        ),
        compiler_params=pltpu.CompilerParams(
            dimension_semantics=("parallel",),
            vmem_limit_bytes=vmem_limit,
        ),
        cost_estimate=cost,
    )(x2d)

    # (degree+1, n_rows, 128) -> (degree+1, N): reshape is free, slice only if
    # padding was added.
    out2d = out.reshape(n_out, n_pad)
    if n_pad != n:
        out2d = out2d[:, :n]
    if not transpose_output:
        return out2d                    # lane-major; skips an HBM round trip
    return out2d.T                      # torch layout (N, degree+1)


def legendre_ref(x: jax.Array, degree: int) -> jax.Array:
    """Pure-JAX reference mirroring the PyTorch implementation."""
    xf = x.reshape(-1, 1).astype(jnp.float32)
    polys = [jnp.ones_like(xf)]
    if degree > 0:
        polys.append(xf)
        for ii in range(1, degree):
            p_next = ((2 * ii + 1) * xf * polys[-1] - ii * polys[-2]) / (ii + 1)
            polys.append(p_next)
    return jnp.concatenate(polys, axis=1)


if __name__ == "__main__":
    DEGREE = 4
    key = jax.random.PRNGKey(0)
    # Small example input (any shape works; it is flattened like x.reshape(-1, 1)).
    x = jax.random.uniform(key, (2, 4, 16, 16), dtype=jnp.float32,
                           minval=-1.0, maxval=1.0)

    out = legendre_pallas(x, DEGREE)
    out = jax.block_until_ready(out)

    ref = legendre_ref(x, DEGREE)
    assert out.shape == (x.size, DEGREE + 1), out.shape
    assert jnp.allclose(out, ref, atol=1e-5, rtol=1e-5), "mismatch vs reference"

    print("KERNEL_OK")
</pallas_src>

<mosaic_0001>
module attributes {stable_mosaic.version = 11 : i64} {
  func.func @_legendre_kernel(%arg0: i32, %arg1: memref<8x128xf32, #tpu.memory_space<vmem>>, %arg2: memref<5x8x128xf32, #tpu.memory_space<vmem>>) attributes {dimension_semantics = [#tpu.dimension_semantics<parallel>], iteration_bounds = array<i64: 2>, scalar_prefetch = 0 : i64, scratch_operands = 0 : i64, tpu.core_type = #tpu.core_type<tc>, window_params = [{transform_indices = @transform_0, window_bounds = array<i64: 8, 128>}, {transform_indices = @transform_1, window_bounds = array<i64: 5, 8, 128>}]} {
    %c0_i32 = arith.constant 0 : i32
    %c1_i32 = arith.constant 1 : i32
    %0 = arith.muli %c0_i32, %c1_i32 : i32
    %c0_i32_0 = arith.constant 0 : i32
    %1 = arith.addi %c0_i32_0, %0 : i32
    %c8_i32 = arith.constant 8 : i32
    %2 = arith.muli %1, %c8_i32 : i32
    %3 = tpu.assume_multiple %2, 8 : i32
    %4 = arith.index_cast %3 : i32 to index
    %c0 = arith.constant 0 : index
    %5 = vector.load %arg1[%4, %c0] : memref<8x128xf32, #tpu.memory_space<vmem>>, vector<8x128xf32>
    %cst = arith.constant 1.000000e+00 : f32
    %6 = vector.broadcast %cst : f32 to vector<8x128xf32>
    %c0_1 = arith.constant 0 : index
    %7 = arith.index_cast %3 : i32 to index
    %c0_2 = arith.constant 0 : index
    %8 = vector.load %arg2[%c0_1, %7, %c0_2] : memref<5x8x128xf32, #tpu.memory_space<vmem>>, vector<1x8x128xf32>
    %9 = vector.shape_cast %8 : vector<1x8x128xf32> to vector<8x128xf32>
    %10 = vector.shape_cast %6 : vector<8x128xf32> to vector<1x8x128xf32>
    tpu.vector_store %arg2[%c0_1, %7, %c0_2], %10 {strides = array<i32>} : memref<5x8x128xf32, #tpu.memory_space<vmem>>, vector<1x8x128xf32>,
    %c1 = arith.constant 1 : index
    %11 = arith.index_cast %3 : i32 to index
    %c0_3 = arith.constant 0 : index
    %12 = vector.load %arg2[%c1, %11, %c0_3] : memref<5x8x128xf32, #tpu.memory_space<vmem>>, vector<1x8x128xf32>
    %13 = vector.shape_cast %12 : vector<1x8x128xf32> to vector<8x128xf32>
    %14 = vector.shape_cast %5 : vector<8x128xf32> to vector<1x8x128xf32>
    tpu.vector_store %arg2[%c1, %11, %c0_3], %14 {strides = array<i32>} : memref<5x8x128xf32, #tpu.memory_space<vmem>>, vector<1x8x128xf32>,
    %cst_4 = arith.constant 1.500000e+00 : f32
    %15 = vector.broadcast %cst_4 : f32 to vector<8x128xf32>
    %16 = arith.mulf %15, %5 : vector<8x128xf32>
    %17 = arith.mulf %16, %5 : vector<8x128xf32>
    %cst_5 = arith.constant 5.000000e-01 : f32
    %18 = vector.broadcast %cst_5 : f32 to vector<8x128xf32>
    %19 = arith.mulf %18, %6 : vector<8x128xf32>
    %20 = arith.subf %17, %19 : vector<8x128xf32>
    %c2 = arith.constant 2 : index
    %21 = arith.index_cast %3 : i32 to index
    %c0_6 = arith.constant 0 : index
    %22 = vector.load %arg2[%c2, %21, %c0_6] : memref<5x8x128xf32, #tpu.memory_space<vmem>>, vector<1x8x128xf32>
    %23 = vector.shape_cast %22 : vector<1x8x128xf32> to vector<8x128xf32>
    %24 = vector.shape_cast %20 : vector<8x128xf32> to vector<1x8x128xf32>
    tpu.vector_store %arg2[%c2, %21, %c0_6], %24 {strides = array<i32>} : memref<5x8x128xf32, #tpu.memory_space<vmem>>, vector<1x8x128xf32>,
    %cst_7 = arith.constant 1.66666663 : f32
    %25 = vector.broadcast %cst_7 : f32 to vector<8x128xf32>
    %26 = arith.mulf %25, %5 : vector<8x128xf32>
    %27 = arith.mulf %26, %20 : vector<8x128xf32>
    %cst_8 = arith.constant 0.666666686 : f32
    %28 = vector.broadcast %cst_8 : f32 to vector<8x128xf32>
    %29 = arith.mulf %28, %5 : vector<8x128xf32>
    %30 = arith.subf %27, %29 : vector<8x128xf32>
    %c3 = arith.constant 3 : index
    %31 = arith.index_cast %3 : i32 to index
    %c0_9 = arith.constant 0 : index
    %32 = vector.load %arg2[%c3, %31, %c0_9] : memref<5x8x128xf32, #tpu.memory_space<vmem>>, vector<1x8x128xf32>
    %33 = vector.shape_cast %32 : vector<1x8x128xf32> to vector<8x128xf32>
    %34 = vector.shape_cast %30 : vector<8x128xf32> to vector<1x8x128xf32>
    tpu.vector_store %arg2[%c3, %31, %c0_9], %34 {strides = array<i32>} : memref<5x8x128xf32, #tpu.memory_space<vmem>>, vector<1x8x128xf32>,
    %cst_10 = arith.constant 1.750000e+00 : f32
    %35 = vector.broadcast %cst_10 : f32 to vector<8x128xf32>
    %36 = arith.mulf %35, %5 : vector<8x128xf32>
    %37 = arith.mulf %36, %30 : vector<8x128xf32>
    %cst_11 = arith.constant 7.500000e-01 : f32
    %38 = vector.broadcast %cst_11 : f32 to vector<8x128xf32>
    %39 = arith.mulf %38, %20 : vector<8x128xf32>
    %40 = arith.subf %37, %39 : vector<8x128xf32>
    %c4 = arith.constant 4 : index
    %41 = arith.index_cast %3 : i32 to index
    %c0_12 = arith.constant 0 : index
    %42 = vector.load %arg2[%c4, %41, %c0_12] : memref<5x8x128xf32, #tpu.memory_space<vmem>>, vector<1x8x128xf32>
    %43 = vector.shape_cast %42 : vector<1x8x128xf32> to vector<8x128xf32>
    %44 = vector.shape_cast %40 : vector<8x128xf32> to vector<1x8x128xf32>
    tpu.vector_store %arg2[%c4, %41, %c0_12], %44 {strides = array<i32>} : memref<5x8x128xf32, #tpu.memory_space<vmem>>, vector<1x8x128xf32>,
    %c1_i32_13 = arith.constant 1 : i32
    return
  }
  func.func @transform_0(%arg0: i32) -> (i32, i32) {
    %c0_i32 = arith.constant 0 : i32
    %c0_i32_0 = arith.constant 0 : i32
    return %arg0, %c0_i32 : i32, i32
  }
  func.func @transform_1(%arg0: i32) -> (i32, i32, i32) {
    %c0_i32 = arith.constant 0 : i32
    %c0_i32_0 = arith.constant 0 : i32
    %c0_i32_1 = arith.constant 0 : i32
    return %c0_i32, %arg0, %c0_i32_0 : i32, i32, i32
  }
}

</mosaic_0001>

<bundles_post_ra>
// kernel: tpu_custom_call.1
= control target key start
LH: loop header
LB: loop body
LE: loop exit
PB: predicated region body
PF: predicated region fallthrough
CT: control target
= control target key end

     0   :  { %6 = vsyncpa [#allocation3], 0  ;;  %s591_s0 = inlined_call_operand.hbm [shape: f32[16,128], index: 0, kind: input, shape index: {}]   ;;  %s592_s1 = inlined_call_operand.hbm [shape: f32[5,16,128], index: 1, kind: output, shape index: {}]  }
   0x1   :  { %8 = vsyncpa [#allocation3 + $0x1], 0 }
   0x2   :  { %9 = vsyncpa [#allocation4], 0 }
   0x3   :  { %11 = vsyncpa [#allocation4 + $0x1], 0  ;;  %s427_s6 = smov 0   ;;  %s429_s7 = smov 0  }
   0x4   :  { %s431_s8 = smov 0   ;;  %s433_s9 = smov 0  }
   0x5 LB: > { %s448_s10 = sadd.s32 4294967295, %s409_s9   ;;  %s247_s11 = sadd.s32 4294967294, %s409_s9   ;;  %s409_s9 = sphi %s433_s9, %s607_s9   ;;  %s405_s8 = sphi %s431_s8, %s606_s8   ;;  %s401_s7 = sphi %s429_s7, %s605_s7   ;;  %s397_s6 = sphi %s427_s6, %s604_s6  }
   0x6   : > { %s452_s12 = sadd.s32 1, %s409_s9   ;;  %s24_s13 = sadd.s32 1, %s405_s8 }
   0x7   : > { %s21_s14 = ssub.s32 %s409_s9, %s452_s12  ;;  %p31_p0 = scmp.ne.s32.totalorder %s405_s8, %s401_s7 }
   0x8   : > { %p22_p1 = scmp.eq.s32.totalorder %s21_s14, 0  ;;  %p32_p2 = scmp.eq.s32.totalorder %s409_s9, 0 }
   0x9   : > { %p37_p3 = scmp.ne.s32.totalorder %s401_s7, %s397_s6  ;;  %p38_p4 = scmp.eq.s32.totalorder %s448_s10, 0 }
   0xa   : > { %s464_s15 = scalar_select %p22_p1, %s405_s8, %s24_s13  }
   0xb   : > { %p466_p5 = por %p32_p2, %p31_p0  ;;  %p470_p6 = por %p38_p4, %p37_p3 }
   0xc   : > { %p61_p7 = scmp.eq.s32.totalorder %s448_s10, 1  ;;  %p67_p8 = scmp.eq.s32.totalorder %s247_s11, 1 }
   0xd   : > { %p275_p10 = scmp.lt.s32.totalorder %s409_s9, 2  ;;  %s87_s20 = sand.u32 1, %s405_s8  }
   0xe   : > { %p477_p11 = por %p61_p7, %p31_p0  ;;  %p481_p12 = por %p67_p8, %p37_p3 }
   0xf   : > { %s251_s21 = sshll.u32 %s409_s9, 7  ;;  %s250_s22 = sshll.u32 %s87_s20, 3 }
  0x10   : > { %s596_s18 = scalar_select %p477_p11, 1, 0 }
  0x11   : > { %s597_s19 = scalar_select %p481_p12, 1, 0 }
  0x12   : > { %s490_s25 = scalar_lea.hbm %s591_s0, %s251_s21  ;;  %s91_s26 = scalar_lea.vmem [#allocation2], %s250_s22 }
  0x13   : > { %s98_s27 = sshll.u32 %s91_s26, 4  ;;  %p494_p13 = pnand %p275_p10, %p466_p5  ;;  %s498_s27 = int_to_ptr.vmem [resolvable:$true] %s98_s27 }
  0x14   : > { %s88_s29 = scalar_lea.sflag [#allocation3], %s87_s20  ;;  %s313_s30 = scalar_lea.hbm %s490_s25, 128 }
  0x15   : > { %p314_p2 = scmp.ne.s32.totalorder %s490_s25, %s313_s30  ;;  %p315_p3 = pneg %p494_p13 }
  0x16   : > { %s318_s4 = scalar_lea.hbm %s591_s0, 256  ;;  %p319_p5 = scmp.lt.u32.totalorder %s490_s25, %s591_s0 }
  0x17   : > { %p316_p4 = pnand %p315_p3, %p314_p2  ;;  %p320_p8 = scmp.lt.u32.totalorder %s318_s4, %s313_s30 }
  0x18   : > { %p322_p9 = scmp.lt.u32.totalorder %s313_s30, %s490_s25 }
  0x19   : > { %p317_p7 = pneg %p316_p4  ;;  %p321_p10 = por %p320_p8, %p319_p5 }
  0x1b   : > { %p323_p0 = por %p322_p9, %p321_p10 }
  0x1d   : > { %p324_p1 = pnand %p323_p0, %p317_p7 }
  0x1f   : > { %327 = shalt.err (!%p324_p1)
}
  0x20   : > { %s328_s13 = scalar_lea.vmem %s498_s27, 128  ;;  %s411_s14 = smov [#allocation2]  }
  0x21   : > { %p329_p2 = scmp.ne.s32.totalorder %s498_s27, %s328_s13  ;;  %s333_s16 = sshll.u32 %s411_s14, 4  ;;  %s334_s16 = int_to_ptr.vmem [resolvable:$false] %s333_s16 }
  0x22   : > { %s335_s20 = scalar_lea.vmem %s334_s16, 256  ;;  %p336_p11 = scmp.lt.s32.totalorder %s498_s27, %s334_s16 }
  0x23   : > { %p331_p4 = pnand %p329_p2, %p315_p3  ;;  %p337_p5 = scmp.lt.s32.totalorder %s335_s20, %s328_s13 }
  0x25   : > { %p332_p12 = pneg %p331_p4  ;;  %p338_p8 = por %p337_p5, %p336_p11 }
  0x27   : > { %p339_p9 = pnand %p338_p8, %p332_p12 }
  0x29   : > { %342 = shalt.err (!%p339_p9)
}
  0x2a   : > { %270 = dma.hbm_to_vmem [thread:$0]  (!%p494_p13), %s490_s25, 128, %s498_s27, %s88_s29  }
  0x2b   : > { %p599_p0 = scmp.lt.s32.totalorder %s409_s9, 3  ;;  %p600_p1 = scmp.ge.s32.totalorder %s409_s9, 1 }
  0x2d   : > { %p104_p3 = pnand %p600_p1, %p599_p0 }
  0x2e   : > { %s532_s21 = sand.u32 (!%p104_p3), 1, %s401_s7  }
  0x2f   : > { %107 = sbr.rel (%p104_p3) target bundleno = 86 (0x56), region = 24  ;;  %s253_s22 = sshll.u32 (!%p104_p3), %s532_s21, 3 }
  0x30   : > { %s110_s23 = scalar_lea.sflag (!%p104_p3), [#allocation3], %s532_s21  ;;  %s113_s24 = scalar_lea.vmem (!%p104_p3), [#allocation2], %s253_s22 }
  0x36   : > { %388 = dma.done.wait (%p470_p6), %s110_s23, 128  }
  0x37   : > { %390 = vsyncadd (%p470_p6), %s110_s23, 4294967168  ;;  %s262_s25 = smul.u32 40, %s532_s21  ;;  %v412_v0 = vmov 1.0   ;;  %v132_v1 = vld [vmem:[%s113_s24] sm:$0xff]  ;;  %s259_s17 = sshll.u32 %s448_s10, 7 }
  0x38   : > { %v137_v2 = vmul.f32 1.5, %v132_v1  ;;  %v143_v4 = vmul.f32 1.6666666, %v132_v1  ;;  %v145_v6 = vmul.f32 0.6666667, %v132_v1  ;;  %v150_v8 = vmul.f32 1.75, %v132_v1  ;;  %s545_s30 = scalar_lea.hbm %s592_s1, %s259_s17 }
  0x39   : > { %s131_s26 = scalar_lea.vmem [#allocation5], %s262_s25  ;;  %s158_s2 = scalar_lea.sflag [#allocation4], %s532_s21 }
  0x3a   : > { %133 = vst [vmem:[%s131_s26] sm:$0xff] %v412_v0  ;;  %254 = vst [vmem:[%s131_s26 + $0x8] sm:$0xff] %v132_v1  ;;  %v138_v3 = vmul.f32 %v137_v2, %v132_v1  ;;  %s170_s27 = sshll.u32 %s131_s26, 4  ;;  %p601_p11 = scmp.ne.s32.totalorder %s596_s18, 0  ;;  %s547_s27 = int_to_ptr.vmem [resolvable:$true] %s170_s27 }
  0x3b   : > { %s343_s3 = scalar_lea.vmem %s547_s27, 640  ;;  %s413_s10 = smov [#allocation5]  }
  0x3c   : > { %v255_v5 = vadd.f32 -0.5, %v138_v3  ;;  %p344_p6 = scmp.ne.s32.totalorder %s547_s27, %s343_s3  ;;  %s347_s4 = sshll.u32 %s413_s10, 4  ;;  %s348_s4 = int_to_ptr.vmem [resolvable:$false] %s347_s4 }
  0x3d   : > { %s349_s5 = scalar_lea.vmem %s348_s4, 1280  ;;  %p350_p7 = scmp.lt.s32.totalorder %s547_s27, %s348_s4 }
  0x3e   : > { %256 = vst [vmem:[%s131_s26 + $0x10] sm:$0xff] %v255_v5  ;;  %v144_v7 = vmul.f32 %v255_v5, %v143_v4  ;;  %v152_v10 = vmul.f32 0.75, %v255_v5  ;;  %p345_p12 = pnand %p344_p6, %p601_p11  ;;  %p351_p10 = scmp.lt.s32.totalorder %s349_s5, %s343_s3 }
  0x40   : > { %v146_v9 = vsub.f32 %v144_v7, %v145_v6  ;;  %p346_p13 = pneg %p345_p12  ;;  %p352_p2 = por %p351_p10, %p350_p7 }
  0x42   : > { %257 = vst [vmem:[%s131_s26 + $0x18] sm:$0xff] %v146_v9  ;;  %v151_v11 = vmul.f32 %v150_v8, %v146_v9  ;;  %p353_p4 = pnand %p352_p2, %p346_p13 }
  0x44   : > { %v153_v12 = vsub.f32 %v151_v11, %v152_v10 }
  0x46   : > { %258 = vst [vmem:[%s131_s26 + $0x20] sm:$0xff] %v153_v12 }
  0x47   : > { %356 = shalt.err (!%p353_p4)
}
  0x48   : > { %s357_s11 = scalar_lea.hbm %s545_s30, 640  ;;  %s361_s16 = scalar_lea.hbm %s592_s1, 1280 }
  0x49   : > { %p358_p5 = scmp.ne.s32.totalorder %s545_s30, %s357_s11  ;;  %p362_p0 = scmp.lt.u32.totalorder %s545_s30, %s592_s1 }
  0x4a   : > { %p363_p1 = scmp.lt.u32.totalorder %s361_s16, %s357_s11  ;;  %p365_p6 = scmp.lt.u32.totalorder %s357_s11, %s545_s30 }
  0x4b   : > { %p359_p8 = pnand %p358_p5, %p601_p11 }
  0x4c   : > { %p364_p3 = por %p363_p1, %p362_p0 }
  0x4d   : > { %p360_p9 = pneg %p359_p8 }
  0x4e   : > { %p366_p12 = por %p365_p6, %p364_p3 }
  0x50   : > { %p367_p13 = pnand %p366_p12, %p360_p9 }
  0x52   : > { %370 = shalt.err (!%p367_p13)
}
  0x53   : > { %s414_s23 = smov 128   ;;  %s415_s24 = smov 256  }
  0x54   : > { %s416_s25 = smov 8  }
  0x55   : > { %265 = dma.vmem_to_hbm [thread:$0]  (%p601_p11), %s547_s27, 640, %s545_s30, %s158_s2, %s414_s23, %s415_s24, %s416_s25  }
  0x56 PF: > { %s185_s26 = sand.u32 1, %s397_s6   ;;  %p602_p7 = scmp.ne.s32.totalorder %s597_s19, 0 }
  0x57   : > { %p603_p10 = scmp.ge.s32.totalorder %s409_s9, 2  ;;  %s186_s17 = scalar_lea.sflag [#allocation4], %s185_s26 }
  0x59   : > { %p272_p2 = pnand %p603_p10, %p602_p7 }
  0x5b   : > { %392 = dma.done.wait (!%p272_p2), %s186_s17, 640  }
  0x5c   : > { %394 = vsyncadd (!%p272_p2), %s186_s17, 4294966656  ;;  %p14_p4 = scmp.ge.s32.totalorder %s452_s12, 4   ;;  %s604_s6 = smov %s401_s7 }
  0x5d   : > { %s605_s7 = smov %s405_s8  ;;  %s606_s8 = smov %s464_s15 }
  0x5e   : > { %s607_s9 = smov %s452_s12  ;;  %16 = sbr.rel (!%p14_p4) target bundleno = 5 (0x5), region = 73 }
  0x65   :  { %191 = vsyncpa [#allocation3], 1 }
  0x66   :  { %193 = vsyncpa [#allocation3 + $0x1], 1 }
  0x67   :  { %194 = vsyncpa [#allocation4], 1 }
  0x68   :  { %196 = vsyncpa [#allocation4 + $0x1], 1 }

</bundles_post_ra>
